<compile_context>
chip_gen: v6e
topology: v6e:2x2x1
jax: 0.10.0
libtpu: 0.0.40
codegen_flags: <defaults>
</compile_context>

<pallas_src>
import functools

import jax
import jax.numpy as jnp
from jax.experimental import pallas as pl
from jax.experimental.pallas import tpu as pltpu


# ---------------------------------------------------------------------------
# Fast path: pure-copy kernel; the channel shuffle lives in the index_maps.
# ---------------------------------------------------------------------------
def _copy_kernel(x_ref, o_ref):
    o_ref[...] = x_ref[...]


def _pick_spatial_tile(hw, cpg, itemsize, target_bytes=1 << 20):
    """Largest multiple-of-128 divisor of hw with cpg*T*itemsize <= target."""
    if hw % 128 != 0:
        return None
    divisors = [d for d in range(128, hw + 1, 128) if hw % d == 0]
    max_elems = max(128, target_bytes // max(1, cpg * itemsize))
    fitting = [d for d in divisors if d <= max_elems]
    return max(fitting) if fitting else min(divisors)


def _channel_shuffle_fast(x, groups, *, cost):
    N, C, H, W = x.shape
    HW = H * W
    cpg = C // groups
    itemsize = jnp.dtype(x.dtype).itemsize
    T = _pick_spatial_tile(HW, cpg, itemsize)
    S = HW // T  # number of spatial tiles

    # (N, C, H, W) -> (N, groups, cpg, HW): free metadata reshape in XLA.
    x_v = x.reshape(N, groups, cpg, HW)

    out_flat = pl.pallas_call(
        _copy_kernel,
        out_shape=jax.ShapeDtypeStruct((N, cpg, groups * HW), x.dtype),
        grid=(N, groups, S),
        in_specs=[
            pl.BlockSpec((None, None, cpg, T), lambda n, g, s: (n, g, 0, s)),
        ],
        out_specs=pl.BlockSpec(
            (None, cpg, T), lambda n, g, s: (n, 0, g * S + s)
        ),
        compiler_params=pltpu.CompilerParams(
            dimension_semantics=("parallel", "parallel", "parallel")
        ),
        cost_estimate=cost,
    )(x_v)

    # (N, cpg, groups*HW) is elementwise identical (row-major) to the shuffled
    # (N, C, H, W): index j*(groups*HW) + g*HW + w == (j*groups + g)*HW + w.
    return out_flat.reshape(N, C, H, W)


# ---------------------------------------------------------------------------
# Fallback path (H*W not a multiple of 128): lane-dense in-VMEM permute.
# ---------------------------------------------------------------------------
def _permute_kernel(x_ref, o_ref, *, groups):
    C, HW = x_ref.shape
    cpg = C // groups
    x = x_ref[...].reshape(groups, cpg, HW)          # leading-dim split
    o_ref[...] = jnp.transpose(x, (1, 0, 2)).reshape(C, HW)


def _channel_shuffle_fallback(x, groups, *, cost):
    # TODO(synk): when H*W is not a multiple of 128 the lane dim cannot be
    # tiled; this path loads one full lane-dense (C, H*W) slab per batch
    # element (fine for typical ShuffleNet activation sizes).
    N, C, H, W = x.shape
    HW = H * W
    kernel = functools.partial(_permute_kernel, groups=groups)
    out = pl.pallas_call(
        kernel,
        out_shape=jax.ShapeDtypeStruct((N, C, HW), x.dtype),
        grid=(N,),
        in_specs=[pl.BlockSpec((None, C, HW), lambda n: (n, 0, 0))],
        out_specs=pl.BlockSpec((None, C, HW), lambda n: (n, 0, 0)),
        compiler_params=pltpu.CompilerParams(
            dimension_semantics=("parallel",)
        ),
        cost_estimate=cost,
    )(x.reshape(N, C, HW))
    return out.reshape(N, C, H, W)


def channel_shuffle(x, groups: int):
    N, C, H, W = x.shape
    assert C % groups == 0, "channels must be divisible by groups"
    itemsize = jnp.dtype(x.dtype).itemsize
    cost = pl.CostEstimate(
        flops=0,
        transcendentals=0,
        bytes_accessed=2 * N * C * H * W * itemsize,
    )
    if (H * W) % 128 == 0:
        return _channel_shuffle_fast(x, groups, cost=cost)
    return _channel_shuffle_fallback(x, groups, cost=cost)


def channel_shuffle_ref(x, groups: int):
    # Pure-JAX reference matching torch.channel_shuffle semantics.
    N, C, H, W = x.shape
    cpg = C // groups
    return (
        x.reshape(N, groups, cpg, H, W)
        .transpose(0, 2, 1, 3, 4)
        .reshape(N, C, H, W)
    )


if __name__ == "__main__":
    key = jax.random.PRNGKey(0)

    # Fast (pure-addressing) path: H*W = 256 is a multiple of 128.
    x = jax.random.normal(key, (2, 4, 16, 16), dtype=jnp.float32)
    out = jax.block_until_ready(channel_shuffle(x, 2))
    ref = channel_shuffle_ref(x, 2)
    assert out.shape == ref.shape and out.dtype == ref.dtype
    assert jnp.array_equal(out, ref), "fast path mismatch (f32)"

    # Fast path with a sublane-packed dtype.
    xb = x.astype(jnp.bfloat16)
    outb = jax.block_until_ready(channel_shuffle(xb, 2))
    assert jnp.array_equal(outb, channel_shuffle_ref(xb, 2)), "fast path mismatch (bf16)"

    # Fallback path: H*W = 49 is not a multiple of 128 (ShuffleNet-like 7x7).
    y = jax.random.normal(jax.random.PRNGKey(0), (2, 6, 7, 7), dtype=jnp.float32)
    outy = jax.block_until_ready(channel_shuffle(y, 3))
    assert jnp.array_equal(outy, channel_shuffle_ref(y, 3)), "fallback mismatch"

    print("KERNEL_OK")
</pallas_src>

<mosaic_0001>
module attributes {stable_mosaic.version = 11 : i64} {
  func.func @_copy_kernel(%arg0: i32, %arg1: i32, %arg2: i32, %arg3: memref<1x1x2x256xf32, #tpu.memory_space<vmem>>, %arg4: memref<1x2x256xf32, #tpu.memory_space<vmem>>) attributes {dimension_semantics = [#tpu.dimension_semantics<parallel>, #tpu.dimension_semantics<parallel>, #tpu.dimension_semantics<parallel>], iteration_bounds = array<i64: 2, 2, 1>, scalar_prefetch = 0 : i64, scratch_operands = 0 : i64, tpu.core_type = #tpu.core_type<tc>, window_params = [{transform_indices = @transform_0, window_bounds = array<i64: 1, 1, 2, 256>}, {transform_indices = @transform_1, window_bounds = array<i64: 1, 2, 256>}]} {
    %c0 = arith.constant 0 : index
    %c0_0 = arith.constant 0 : index
    %c0_1 = arith.constant 0 : index
    %c0_2 = arith.constant 0 : index
    %0 = vector.load %arg3[%c0, %c0_0, %c0_1, %c0_2] : memref<1x1x2x256xf32, #tpu.memory_space<vmem>>, vector<1x1x2x256xf32>
    %1 = vector.shape_cast %0 : vector<1x1x2x256xf32> to vector<2x256xf32>
    %c0_3 = arith.constant 0 : index
    %c0_4 = arith.constant 0 : index
    %c0_5 = arith.constant 0 : index
    %2 = vector.load %arg4[%c0_3, %c0_4, %c0_5] : memref<1x2x256xf32, #tpu.memory_space<vmem>>, vector<1x2x256xf32>
    %3 = vector.shape_cast %2 : vector<1x2x256xf32> to vector<2x256xf32>
    %4 = vector.shape_cast %1 : vector<2x256xf32> to vector<1x2x256xf32>
    tpu.vector_store %arg4[%c0_3, %c0_4, %c0_5], %4 {strides = array<i32>} : memref<1x2x256xf32, #tpu.memory_space<vmem>>, vector<1x2x256xf32>,
    return
  }
  func.func @transform_0(%arg0: i32, %arg1: i32, %arg2: i32) -> (i32, i32, i32, i32) {
    %c0_i32 = arith.constant 0 : i32
    %c0_i32_0 = arith.constant 0 : i32
    return %arg0, %arg1, %c0_i32, %arg2 : i32, i32, i32, i32
  }
  func.func @transform_1(%arg0: i32, %arg1: i32, %arg2: i32) -> (i32, i32, i32) {
    %c1_i32 = arith.constant 1 : i32
    %0 = arith.muli %arg1, %c1_i32 : i32
    %1 = arith.addi %0, %arg2 : i32
    %c0_i32 = arith.constant 0 : i32
    %c0_i32_0 = arith.constant 0 : i32
    return %arg0, %c0_i32, %1 : i32, i32, i32
  }
}

</mosaic_0001>

<bundles_post_ra>
// kernel: tpu_custom_call.1
= control target key start
LH: loop header
LB: loop body
LE: loop exit
PB: predicated region body
PF: predicated region fallthrough
CT: control target
= control target key end

     0   :  { %6 = vsyncpa [#allocation3], 0  ;;  %s675_s0 = inlined_call_operand.hbm [shape: f32[2,2,2,256], index: 0, kind: input, shape index: {}]   ;;  %s676_s1 = inlined_call_operand.hbm [shape: f32[2,2,512], index: 1, kind: output, shape index: {}]  }
   0x1   :  { %8 = vsyncpa [#allocation3 + $0x1], 0 }
   0x2   :  { %9 = vsyncpa [#allocation4], 0 }
   0x3   :  { %11 = vsyncpa [#allocation4 + $0x1], 0  ;;  %s513_s6 = smov 0   ;;  %s515_s7 = smov 0  }
   0x4   :  { %s517_s8 = smov 0   ;;  %s519_s9 = smov 0  }
   0x5   :  { %s521_s10 = smov 0   ;;  %s523_s11 = smov 0  }
   0x6   :  { %s525_s12 = smov 0   ;;  %s527_s13 = smov 0  }
   0x7 LB: > { %s280_s14 = sadd.s32 4294967295, %s499_s13   ;;  %s281_s15 = sadd.s32 4294967294, %s499_s13   ;;  %s499_s13 = sphi %s527_s13, %s17_s13   ;;  %s495_s12 = sphi %s525_s12, %s689_s12   ;;  %s491_s11 = sphi %s523_s11, %s688_s11   ;;  %s487_s10 = sphi %s521_s10, %s687_s10   ;;  %s483_s9 = sphi %s519_s9, %s686_s9   ;;  %s479_s8 = sphi %s517_s8, %s685_s8   ;;  %s475_s7 = sphi %s515_s7, %s684_s7   ;;  %s471_s6 = sphi %s513_s6, %s683_s6  }
   0x8   : > { %s32_s16 = sadd.s32 1, %s491_s11  ;;  %s36_s17 = sadd.s32 1, %s495_s12 }
   0x9   : > { %p34_p0 = scmp.ge.s32.totalorder %s32_s16, 2  ;;  %s47_s18 = sadd.s32 1, %s479_s8 }
   0xa   : > { %p54_p1 = scmp.ne.s32.totalorder %s479_s8, %s475_s7  ;;  %p55_p2 = scmp.eq.s32.totalorder %s499_s13, 0 }
   0xb   : > { %s691_s16 = smov (%p34_p0, %s32_s16), 0  ;;  %s693_s17 = smov (!%p34_p0, %s36_s17), %s495_s12 }
   0xc   : > { %s41_s19 = ssub.s32 %s491_s11, %s691_s16  ;;  %p566_p3 = por %p55_p2, %p54_p1 }
   0xd   : > { %p38_p4 = scmp.ge.s32.totalorder %s693_s17, 2  ;;  %p60_p5 = scmp.ne.s32.totalorder %s475_s7, %s471_s6 }
   0xe   : > { %p61_p6 = scmp.eq.s32.totalorder %s280_s14, 0  ;;  %p88_p7 = scmp.eq.s32.totalorder %s280_s14, 3 }
   0xf   : > { %s695_s17 = smov (%p38_p4, %s693_s17), 0  ;;  %p94_p10 = scmp.eq.s32.totalorder %s281_s15, 3 }
  0x10   : > { %p574_p8 = por %p61_p6, %p60_p5  ;;  %p578_p9 = por %p88_p7, %p54_p1 }
  0x11   : > { %s40_s23 = ssub.s32 %s495_s12, %s695_s17  ;;  %p584_p12 = por %p94_p10, %p60_p5 }
  0x12   : > { %s42_s24 = sor.u32 %s41_s19, %s40_s23  ;;  %p309_p13 = scmp.lt.s32.totalorder %s499_s13, 4 }
  0x13   : > { %p45_p11 = scmp.eq.s32.totalorder %s42_s24, 0  ;;  %s114_s26 = sand.u32 1, %s479_s8  }
  0x14   : > { %s680_s25 = scalar_select %p584_p12, 1, 0 }
  0x15   : > { %s591_s27 = scalar_select %p45_p11, %s479_s8, %s47_s18  }
  0x16   : > { %s284_s28 = sshll.u32 %s114_s26, 2  ;;  %s285_s29 = sshll.u32 %s491_s11, 1 }
  0x17   : > { %s286_s30 = sshll.u32 %s495_s12, 2  ;;  %s118_s2 = scalar_lea.vmem [#allocation2], %s284_s28 }
  0x18   : > { %s130_s3 = sshll.u32 %s118_s2, 4  ;;  %s126_s4 = sadd.s32 %s286_s30, %s285_s29  ;;  %s131_s3 = int_to_ptr.vmem [resolvable:$true] %s130_s3 }
  0x19   : > { %s287_s5 = sshll.u32 %s126_s4, 5  ;;  %p597_p0 = pnand %p309_p13, %p566_p3 }
  0x1a   : > { %s128_s23 = scalar_lea.hbm %s675_s0, %s287_s5  ;;  %p288_p1 = scmp.ge.s32.totalorder %s499_s13, 1 }
  0x1b   : > { %p135_p2 = scmp.lt.s32.totalorder %s499_s13, 5  ;;  %s115_s18 = scalar_lea.sflag [#allocation3], %s114_s26 }
  0x1c   : > { %p377_p4 = pneg %p597_p0  ;;  %s388_s24 = scalar_lea.vmem %s131_s3, 64 }
  0x1d   : > { %p389_p5 = scmp.ne.s32.totalorder %s131_s3, %s388_s24  ;;  %s501_s28 = smov [#allocation2]  }
  0x1e   : > { %s393_s20 = sshll.u32 %s501_s28, 4  ;;  %s394_s20 = int_to_ptr.vmem [resolvable:$false] %s393_s20 }
  0x1f   : > { %p391_p6 = pnand %p389_p5, %p377_p4  ;;  %s395_s29 = scalar_lea.vmem %s394_s20, 128 }
  0x20   : > { %p396_p3 = scmp.lt.s32.totalorder %s131_s3, %s394_s20  ;;  %p397_p10 = scmp.lt.s32.totalorder %s395_s29, %s388_s24 }
  0x21   : > { %p392_p7 = pneg %p391_p6 }
  0x22   : > { %p398_p11 = por %p397_p10, %p396_p3 }
  0x24   : > { %p399_p13 = pnand %p398_p11, %p392_p7 }
  0x26   : > { %402 = shalt.err (!%p399_p13)
}
  0x27   : > { %304 = dma.hbm_to_vmem [thread:$0]  (!%p597_p0), %s128_s23, 64, %s131_s3, %s115_s18  }
  0x28   : > { %p136_p12 = pnand %p288_p1, %p135_p2 }
  0x29   : > { %s615_s26 = sand.u32 (!%p136_p12), 1, %s475_s7  }
  0x2a   : > { %139 = sbr.rel (%p136_p12) target bundleno = 73 (0x49), region = 24  ;;  %s289_s30 = sshll.u32 (!%p136_p12), %s615_s26, 2 }
  0x2b   : > { %s142_s2 = scalar_lea.sflag (!%p136_p12), [#allocation3], %s615_s26  ;;  %s145_s4 = scalar_lea.vmem (!%p136_p12), [#allocation2], %s289_s30 }
  0x2f   : > { %462 = dma.done.wait (%p574_p8), %s142_s2, 64  }
  0x30   : > { %464 = vsyncadd (%p574_p8), %s142_s2, 4294967232  ;;  %s292_s3 = sshll.u32 %s483_s9, 1  ;;  %s293_s5 = sshll.u32 %s487_s10, 2  ;;  %v167_v0 = vld [vmem:[%s145_s4] sm:$0xf] }
  0x31   : > { %s163_s14 = scalar_lea.vmem [#allocation5], %s289_s30  ;;  %s183_s19 = sadd.s32 %s293_s5, %s292_s3 }
  0x32   : > { %s187_s15 = sshll.u32 %s163_s14, 4  ;;  %s294_s23 = sshll.u32 %s183_s19, 5  ;;  %168 = vst [vmem:[%s163_s14] sm:$0xf] %v167_v0  ;;  %s625_s15 = int_to_ptr.vmem [resolvable:$true] %s187_s15 }
  0x33   : > { %s185_s21 = scalar_lea.hbm %s676_s1, %s294_s23  ;;  %s170_s28 = scalar_lea.sflag [#allocation4], %s615_s26 }
  0x34   : > { %s403_s20 = scalar_lea.vmem %s625_s15, 64  ;;  %s502_s9 = smov [#allocation5]  }
  0x35   : > { %p404_p8 = scmp.ne.s32.totalorder %s625_s15, %s403_s20  ;;  %s407_s10 = sshll.u32 %s502_s9, 4  ;;  %s408_s10 = int_to_ptr.vmem [resolvable:$false] %s407_s10 }
  0x36   : > { %s409_s29 = scalar_lea.vmem %s408_s10, 128  ;;  %p410_p1 = scmp.lt.s32.totalorder %s625_s15, %s408_s10 }
  0x37   : > { %p405_p12 = pnand %p404_p8, %p578_p9  ;;  %p411_p2 = scmp.lt.s32.totalorder %s409_s29, %s403_s20 }
  0x39   : > { %p406_p0 = pneg %p405_p12  ;;  %p412_p4 = por %p411_p2, %p410_p1 }
  0x3b   : > { %p413_p5 = pnand %p412_p4, %p406_p0 }
  0x3d   : > { %416 = shalt.err (!%p413_p5)
}
  0x3e   : > { %s417_s30 = scalar_lea.hbm %s185_s21, 64  ;;  %s421_s4 = scalar_lea.hbm %s676_s1, 256 }
  0x3f   : > { %p418_p6 = scmp.ne.s32.totalorder %s185_s21, %s417_s30  ;;  %p422_p10 = scmp.lt.s32.totalorder %s185_s21, %s676_s1 }
  0x40   : > { %p423_p11 = scmp.lt.s32.totalorder %s421_s4, %s417_s30 }
  0x41   : > { %p419_p7 = pnand %p418_p6, %p578_p9 }
  0x42   : > { %p424_p13 = por %p423_p11, %p422_p10 }
  0x43   : > { %p420_p3 = pneg %p419_p7 }
  0x45   : > { %p425_p8 = pnand %p424_p13, %p420_p3 }
  0x47   : > { %428 = shalt.err (!%p425_p8)
}
  0x48   : > { %299 = dma.vmem_to_hbm [thread:$0]  (%p578_p9), %s625_s15, 64, %s185_s21, %s170_s28  }
  0x49 PF: > { %p310_p12 = scmp.ge.s32.totalorder %s499_s13, 2  ;;  %s199_s14 = sand.u32 1, %s471_s6  }
  0x4a   : > { %p682_p0 = scmp.ne.s32.totalorder %s680_s25, 0  ;;  %s200_s19 = scalar_lea.sflag [#allocation4], %s199_s14 }
  0x4c   : > { %p306_p1 = pnand %p310_p12, %p682_p0 }
  0x4e   : > { %p307_p2 = pneg %p306_p1 }
  0x50   : > { %466 = dma.done.wait (%p307_p2), %s200_s19, 64  }
  0x51   : > { %468 = vsyncadd (%p307_p2), %s200_s19, 4294967232  ;;  %s17_s13 = sadd.s32 1, %s499_s13   ;;  %s683_s6 = smov %s475_s7 }
  0x52   : > { %p14_p4 = scmp.ge.s32.totalorder %s17_s13, 6   ;;  %s684_s7 = smov %s479_s8 }
  0x53   : > { %s685_s8 = smov %s591_s27  ;;  %s686_s9 = smov %s491_s11 }
  0x54   : > { %s687_s10 = smov %s495_s12  ;;  %s688_s11 = smov %s691_s16 }
  0x55   : > { %s689_s12 = smov %s695_s17  ;;  %16 = sbr.rel (!%p14_p4) target bundleno = 7 (0x7), region = 69 }
  0x5a   :  { %205 = vsyncpa [#allocation3], 1 }
  0x5b   :  { %207 = vsyncpa [#allocation3 + $0x1], 1 }
  0x5c   :  { %208 = vsyncpa [#allocation4], 1 }
  0x5d   :  { %210 = vsyncpa [#allocation4 + $0x1], 1 }

</bundles_post_ra>
